<compile_context>
chip_gen: v6e
topology: v6e:2x2x1
jax: 0.10.0
libtpu: 0.0.40
codegen_flags: <defaults>
</compile_context>

<pallas_src>
import functools
import math

import jax
import jax.numpy as jnp
from jax.experimental import pallas as pl
from jax.experimental.pallas import tpu as pltpu


def get_positional_encoding(d_model: int, max_len: int = 5000, dtype=jnp.float32):
    """Sinusoidal table, same math as the PyTorch helper. Shape (max_len, 1, d_model)."""
    position = jnp.arange(max_len, dtype=jnp.float32)[:, None]            # (max_len, 1)
    two_i = jnp.arange(0, d_model, 2, dtype=jnp.float32)                  # (d_model//2,)
    div_term = jnp.exp(two_i * -(math.log(10000.0) / d_model))
    enc = jnp.zeros((max_len, d_model), jnp.float32)
    enc = enc.at[:, 0::2].set(jnp.sin(position * div_term))
    enc = enc.at[:, 1::2].set(jnp.cos(position * div_term))
    return enc.astype(dtype)[:, None, :]                                  # (max_len, 1, d_model)


def _pe_add_kernel(x_ref, pe_ref, o_ref):
    # x_ref: (t_seq, batch, d_model)   pe_ref: (t_seq, d_model), already x.dtype
    o_ref[...] = x_ref[...] + pe_ref[...][:, None, :]


def _pe_add_dropout_kernel(x_ref, pe_ref, bits_ref, o_ref, *, keep_threshold, inv_keep):
    # Fused (x + pe) and inverted dropout; keep-test is a raw uint32 threshold
    # compare, all arithmetic stays in x.dtype.
    y = x_ref[...] + pe_ref[...][:, None, :]
    keep = bits_ref[...] < jnp.uint32(keep_threshold)
    o_ref[...] = jnp.where(keep,
                           y * jnp.asarray(inv_keep, y.dtype),
                           jnp.asarray(0.0, y.dtype))


def _budget_and_vmem_limit():
    """Generation-aware (block budget bytes, vmem_limit_bytes)."""
    try:
        kind = jax.devices()[0].device_kind.lower()
    except Exception:
        kind = ""
    if any(g in kind for g in ("v4", "v5", "v6")):
        return 8 << 20, 64 << 20      # 128 MiB physical VMEM: bigger tiles OK
    return 4 << 20, 32 << 20          # v7x (64 MiB / TC) or unknown: conservative


def positional_encoding_forward(x, pe, *, dropout_prob=0.0, training=False,
                                rng_key=None, seed=0, t_seq=None):
    """x: (seq, batch, d_model); pe: (max_len, 1, d_model) buffer (or (max_len, d_model))."""
    seq, batch, d_model = x.shape
    pe = jnp.asarray(pe)
    if pe.ndim == 3:
        assert pe.shape[1] == 1 and pe.shape[2] == d_model
        pe2d = pe[:, 0, :]
    else:
        assert pe.ndim == 2 and pe.shape[1] == d_model
        pe2d = pe
    assert pe2d.shape[0] >= seq, "positional-encoding table shorter than sequence"
    assert 0.0 <= dropout_prob < 1.0

    # Dense (seq, d_model) slab in the compute dtype: no singleton-dim sublane
    # padding inside pe blocks, no per-element casts in the kernel.
    pe2d = pe2d[:seq].astype(x.dtype)

    itemsize = jnp.dtype(x.dtype).itemsize
    sublane = max(1, 32 // itemsize)          # 8 (f32) / 16 (bf16) / 32 (int8)
    budget, vmem_limit = _budget_and_vmem_limit()

    if t_seq is None:
        row_bytes = batch * d_model * itemsize
        t_seq = max(1, budget // max(1, row_bytes))
        # At least 2 blocks (when seq allows) so the "parallel" grid axis can
        # actually split across v7x's two TensorCores.
        t_seq = min(t_seq, pl.cdiv(seq, 2))
    t_seq = int(min(t_seq, seq))
    if t_seq < seq:
        # The (8,128) rule applies to the 2D pe block (t_seq, d_model): keep
        # t_seq a sublane multiple; tiny sequences fall back to one full block.
        t_seq = (t_seq // sublane) * sublane or seq

    grid = (pl.cdiv(seq, t_seq),)
    x_block = (t_seq, batch, d_model)
    x_spec = pl.BlockSpec(x_block, lambda i: (i, 0, 0))
    pe_spec = pl.BlockSpec((t_seq, d_model), lambda i: (i, 0))
    out_shape = jax.ShapeDtypeStruct(x.shape, x.dtype)
    compiler_params = pltpu.CompilerParams(
        dimension_semantics=("parallel",),     # v7x: shard seq over the 2 TCs
        vmem_limit_bytes=vmem_limit,
    )

    use_dropout = training and dropout_prob > 0.0
    if not use_dropout:
        return pl.pallas_call(
            _pe_add_kernel,
            out_shape=out_shape,
            grid_spec=pltpu.PrefetchScalarGridSpec(
                num_scalar_prefetch=0,
                grid=grid,
                in_specs=[x_spec, pe_spec],
                out_specs=x_spec,
            ),
            compiler_params=compiler_params,
        )(x, pe2d)

    keep_prob = 1.0 - float(dropout_prob)
    keep_threshold = min(int(round(keep_prob * 2.0 ** 32)), 2 ** 32 - 1)
    if rng_key is None:
        rng_key = jax.random.PRNGKey(seed)
    bits = jax.random.bits(rng_key, x.shape, dtype=jnp.uint32)

    kernel = functools.partial(_pe_add_dropout_kernel,
                               keep_threshold=keep_threshold,
                               inv_keep=1.0 / keep_prob)
    return pl.pallas_call(
        kernel,
        out_shape=out_shape,
        grid_spec=pltpu.PrefetchScalarGridSpec(
            num_scalar_prefetch=0,
            grid=grid,
            in_specs=[x_spec, pe_spec, pl.BlockSpec(x_block, lambda i: (i, 0, 0))],
            out_specs=x_spec,
        ),
        compiler_params=compiler_params,
    )(x, pe2d, bits)


if __name__ == "__main__":
    # Small shapes consistent with the module: x is (seq, batch, d_model).
    d_model, max_len = 128, 256
    seq, batch = 20, 4
    dropout_prob = 0.1

    key = jax.random.PRNGKey(0)
    kx, kdrop = jax.random.split(key)
    x = jax.random.normal(kx, (seq, batch, d_model), jnp.float32)
    pe = get_positional_encoding(d_model, max_len)           # (max_len, 1, d_model)
    ref = x + pe[:seq]

    # Eval mode, explicit tile -> multi-step grid with a ragged last block (8,8,4).
    out_eval = jax.block_until_ready(
        positional_encoding_forward(x, pe, dropout_prob=dropout_prob,
                                    training=False, t_seq=8))
    assert out_eval.shape == x.shape and out_eval.dtype == x.dtype
    assert jnp.allclose(out_eval, ref, atol=1e-6, rtol=1e-6)

    # Default adaptive tiling (>=2 blocks, sublane-aligned).
    out_eval2 = jax.block_until_ready(
        positional_encoding_forward(x, pe, dropout_prob=dropout_prob,
                                    training=False))
    assert jnp.allclose(out_eval2, ref, atol=1e-6, rtol=1e-6)

    # Training mode: every element is either 0 or (x+pe)/(1-p), drop fraction ~ p.
    out_train = jax.block_until_ready(
        positional_encoding_forward(x, pe, dropout_prob=dropout_prob,
                                    training=True, rng_key=kdrop, t_seq=8))
    scaled = ref / (1.0 - dropout_prob)
    is_zero = out_train == 0.0
    matches = jnp.isclose(out_train, scaled, atol=1e-5, rtol=1e-5)
    assert bool(jnp.all(is_zero | matches))
    drop_frac = float(jnp.mean(is_zero.astype(jnp.float32)))
    assert 0.0 < drop_frac < 0.3, drop_frac

    print("KERNEL_OK")
</pallas_src>

<mosaic_0001>
module attributes {stable_mosaic.version = 11 : i64} {
  func.func @_pe_add_kernel(%arg0: i32, %arg1: memref<8x4x128xf32, #tpu.memory_space<vmem>>, %arg2: memref<8x128xf32, #tpu.memory_space<vmem>>, %arg3: memref<8x4x128xf32, #tpu.memory_space<vmem>>) attributes {dimension_semantics = [#tpu.dimension_semantics<parallel>], iteration_bounds = array<i64: 3>, scalar_prefetch = 0 : i64, scratch_operands = 0 : i64, tpu.core_type = #tpu.core_type<tc>, window_params = [{transform_indices = @transform_0, window_bounds = array<i64: 8, 4, 128>}, {transform_indices = @transform_1, window_bounds = array<i64: 8, 128>}, {transform_indices = @transform_2, window_bounds = array<i64: 8, 4, 128>}]} {
    %c0 = arith.constant 0 : index
    %c0_0 = arith.constant 0 : index
    %c0_1 = arith.constant 0 : index
    %0 = vector.load %arg1[%c0, %c0_0, %c0_1] : memref<8x4x128xf32, #tpu.memory_space<vmem>>, vector<8x4x128xf32>
    %c0_2 = arith.constant 0 : index
    %c0_3 = arith.constant 0 : index
    %1 = vector.load %arg2[%c0_2, %c0_3] : memref<8x128xf32, #tpu.memory_space<vmem>>, vector<8x128xf32>
    %2 = vector.shape_cast %1 : vector<8x128xf32> to vector<8x1x128xf32>
    %3 = vector.broadcast %2 : vector<8x1x128xf32> to vector<8x4x128xf32>
    %4 = arith.addf %0, %3 : vector<8x4x128xf32>
    %c0_4 = arith.constant 0 : index
    %c0_5 = arith.constant 0 : index
    %c0_6 = arith.constant 0 : index
    %5 = vector.load %arg3[%c0_4, %c0_5, %c0_6] : memref<8x4x128xf32, #tpu.memory_space<vmem>>, vector<8x4x128xf32>
    tpu.vector_store %arg3[%c0_4, %c0_5, %c0_6], %4 {strides = array<i32>} : memref<8x4x128xf32, #tpu.memory_space<vmem>>, vector<8x4x128xf32>,
    return
  }
  func.func @transform_0(%arg0: i32) -> (i32, i32, i32) {
    %c0_i32 = arith.constant 0 : i32
    %c0_i32_0 = arith.constant 0 : i32
    %c0_i32_1 = arith.constant 0 : i32
    return %arg0, %c0_i32, %c0_i32_0 : i32, i32, i32
  }
  func.func @transform_1(%arg0: i32) -> (i32, i32) {
    %c0_i32 = arith.constant 0 : i32
    %c0_i32_0 = arith.constant 0 : i32
    return %arg0, %c0_i32 : i32, i32
  }
  func.func @transform_2(%arg0: i32) -> (i32, i32, i32) {
    %c0_i32 = arith.constant 0 : i32
    %c0_i32_0 = arith.constant 0 : i32
    %c0_i32_1 = arith.constant 0 : i32
    return %arg0, %c0_i32, %c0_i32_0 : i32, i32, i32
  }
}

</mosaic_0001>

<bundles_post_ra>
// kernel: tpu_custom_call.1
= control target key start
LH: loop header
LB: loop body
LE: loop exit
PB: predicated region body
PF: predicated region fallthrough
CT: control target
= control target key end

     0   :  { %7 = vsyncpa [#allocation3], 0  ;;  %s890_s0 = inlined_call_operand.hbm [shape: f32[20,4,128], index: 0, kind: input, shape index: {}]   ;;  %s891_s1 = inlined_call_operand.hbm [shape: f32[20,128], index: 1, kind: input, shape index: {}]   ;;  %s892_s2 = inlined_call_operand.hbm [shape: f32[20,4,128], index: 2, kind: output, shape index: {}]  }
   0x1   :  { %9 = vsyncpa [#allocation3 + $0x1], 0 }
   0x2   :  { %10 = vsyncpa [#allocation6], 0 }
   0x3   :  { %12 = vsyncpa [#allocation6 + $0x1], 0 }
   0x4   :  { %13 = vsyncpa [#allocation4], 0 }
   0x5   :  { %15 = vsyncpa [#allocation4 + $0x1], 0  ;;  %s665_s9 = smov 0   ;;  %s667_s10 = smov 0  }
   0x6   :  { %s669_s11 = smov 0   ;;  %s671_s12 = smov 0  }
   0x7 LB: > { %s686_s13 = sadd.s32 4294967295, %s640_s12   ;;  %s446_s14 = sadd.s32 4294967294, %s640_s12   ;;  %s640_s12 = sphi %s671_s12, %s902_s12   ;;  %s636_s11 = sphi %s669_s11, %s901_s11   ;;  %s632_s10 = sphi %s667_s10, %s900_s10   ;;  %s628_s9 = sphi %s665_s9, %s899_s9  }
   0x8   : > { %s690_s15 = sadd.s32 1, %s640_s12   ;;  %s28_s16 = sadd.s32 1, %s636_s11 }
   0x9   : > { %s25_s17 = ssub.s32 %s640_s12, %s690_s15  ;;  %p35_p0 = scmp.ne.s32.totalorder %s636_s11, %s632_s10 }
   0xa   : > { %p26_p1 = scmp.eq.s32.totalorder %s25_s17, 0  ;;  %p36_p2 = scmp.eq.s32.totalorder %s640_s12, 0 }
   0xb   : > { %p41_p3 = scmp.ne.s32.totalorder %s632_s10, %s628_s9  ;;  %p42_p4 = scmp.eq.s32.totalorder %s686_s13, 0 }
   0xc   : > { %s702_s18 = scalar_select %p26_p1, %s636_s11, %s28_s16  }
   0xd   : > { %p704_p5 = por %p36_p2, %p35_p0  ;;  %p708_p6 = por %p42_p4, %p41_p3 }
   0xe   : > { %p91_p7 = scmp.eq.s32.totalorder %s686_s13, 2  ;;  %p97_p8 = scmp.eq.s32.totalorder %s446_s14, 2 }
   0xf   : > { %p448_p11 = scmp.ge.s32.totalorder %s640_s12, 3 }
  0x10   : > { %p713_p9 = por %p91_p7, %p35_p0  ;;  %p717_p10 = por %p97_p8, %p41_p3 }
  0x11   : > { %113 = sbr.rel (%p448_p11) target bundleno = 78 (0x4e), region = 16 }
  0x12   : > { %s895_s21 = scalar_select %p713_p9, 1, 0 }
  0x13   : > { %s896_s22 = scalar_select %p717_p10, 1, 0 }
  0x16   : > { %116 = sbr.rel (!%p704_p5) target bundleno = 54 (0x36), region = 20  ;;  %s117_s23 = sand.u32 (%p704_p5), 1, %s636_s11  }
  0x17   : > { %s450_s24 = sshll.u32 (%p704_p5), %s640_s12, 3  ;;  %s449_s25 = sshll.u32 (%p704_p5), %s117_s23, 5 }
  0x18   : > { %s123_s26 = ssub.s32 (%p704_p5), 20, %s450_s24  ;;  %s729_s29 = scalar_lea.sflag (%p704_p5), [#allocation3], %s117_s23 }
  0x19   : > { %p124_p12 = scmp.lt.s32.totalorder (%p704_p5), %s123_s26, 8  ;;  %s121_s30 = scalar_lea.vmem (%p704_p5), [#allocation2], %s449_s25 }
  0x1b   : > { %s904_s26 = smov (!%p124_p12, %s123_s26), 8 }
  0x1c   : > { %s726_s27 = sshll.u32 %s904_s26, 6 }
  0x1d   : > { %s128_s28 = ssub.s32 512, %s726_s27 }
  0x1e   : > { %129 = vsyncadd %s729_s29, %s128_s28  ;;  %p452_p13 = scmp.ne.s32.totalorder %s726_s27, 0  ;;  %s471_s3 = sshll.u32 %s640_s12, 9 }
  0x1f   : > { %s737_s6 = scalar_lea.hbm %s890_s0, %s471_s3  ;;  %s134_s7 = sshll.u32 %s121_s30, 4  ;;  %s739_s7 = int_to_ptr.vmem [resolvable:$true] %s134_s7 }
  0x20   : > { %s520_s8 = scalar_lea.hbm %s737_s6, %s726_s27  ;;  %s524_s17 = scalar_lea.hbm %s890_s0, 1280 }
  0x21   : > { %p521_p0 = scmp.ne.s32.totalorder %s737_s6, %s520_s8  ;;  %p525_p3 = scmp.lt.s32.totalorder %s737_s6, %s890_s0 }
  0x22   : > { %p526_p4 = scmp.lt.s32.totalorder %s524_s17, %s520_s8 }
  0x23   : > { %p522_p1 = pnand %p521_p0, %p452_p13 }
  0x24   : > { %p527_p7 = por %p526_p4, %p525_p3 }
  0x25   : > { %p523_p2 = pneg %p522_p1 }
  0x27   : > { %p528_p8 = pnand %p527_p7, %p523_p2 }
  0x29   : > { %531 = shalt.err (!%p528_p8)
}
  0x2a   : > { %s532_s25 = scalar_lea.vmem %s739_s7, %s726_s27  ;;  %s642_s26 = smov [#allocation2]  }
  0x2b   : > { %p533_p11 = scmp.ne.s32.totalorder %s739_s7, %s532_s25  ;;  %s536_s28 = sshll.u32 %s642_s26, 4  ;;  %s537_s28 = int_to_ptr.vmem [resolvable:$false] %s536_s28 }
  0x2c   : > { %s538_s30 = scalar_lea.vmem %s537_s28, 1024  ;;  %p539_p1 = scmp.lt.s32.totalorder %s739_s7, %s537_s28 }
  0x2d   : > { %p534_p12 = pnand %p533_p11, %p452_p13  ;;  %p540_p10 = scmp.lt.s32.totalorder %s538_s30, %s532_s25 }
  0x2f   : > { %p535_p0 = pneg %p534_p12  ;;  %p541_p9 = por %p540_p10, %p539_p1 }
  0x31   : > { %p542_p3 = pnand %p541_p9, %p535_p0 }
  0x33   : > { %545 = shalt.err (!%p542_p3)
}
  0x34   : > { %s643_s3 = smov 64   ;;  %s644_s4 = smov 4  }
  0x35   : > { %140 = dma.hbm_to_vmem [thread:$0]  (%p452_p13), %s737_s6, %s726_s27, %s739_s7, %s729_s29, %s643_s3, %s643_s3, %s644_s4  }
  0x36 PF: > { %s144_s5 = sand.u32 1, %s636_s11   ;;  %s457_s8 = sshll.u32 %s640_s12, 7 }
  0x37   : > { %s456_s14 = sshll.u32 %s144_s5, 3  ;;  %s770_s23 = scalar_lea.hbm %s891_s1, %s457_s8 }
  0x38   : > { %s148_s24 = scalar_lea.vmem [#allocation5], %s456_s14  ;;  %s145_s26 = scalar_lea.sflag [#allocation6], %s144_s5 }
  0x39   : > { %s155_s25 = sshll.u32 %s148_s24, 4  ;;  %s546_s27 = scalar_lea.hbm %s770_s23, 128  ;;  %s156_s25 = int_to_ptr.vmem [resolvable:$true] %s155_s25 }
  0x3a   : > { %p547_p9 = scmp.ne.s32.totalorder %s770_s23, %s546_s27  ;;  %s550_s7 = scalar_lea.hbm %s891_s1, 384 }
  0x3b   : > { %p551_p2 = scmp.lt.s32.totalorder %s770_s23, %s891_s1  ;;  %p552_p4 = scmp.lt.s32.totalorder %s550_s7, %s546_s27 }
  0x3c   : > { %p548_p10 = pnand %p547_p9, %p704_p5 }
  0x3d   : > { %p553_p7 = por %p552_p4, %p551_p2 }
  0x3e   : > { %p549_p13 = pneg %p548_p10 }
  0x40   : > { %p554_p8 = pnand %p553_p7, %p549_p13 }
  0x42   : > { %557 = shalt.err (!%p554_p8)
}
  0x43   : > { %s558_s3 = scalar_lea.vmem %s156_s25, 128  ;;  %s645_s4 = smov [#allocation5]  }
  0x44   : > { %p559_p11 = scmp.ne.s32.totalorder %s156_s25, %s558_s3  ;;  %s562_s5 = sshll.u32 %s645_s4, 4  ;;  %s563_s5 = int_to_ptr.vmem [resolvable:$false] %s562_s5 }
  0x45   : > { %s564_s8 = scalar_lea.vmem %s563_s5, 256  ;;  %p565_p1 = scmp.lt.s32.totalorder %s156_s25, %s563_s5 }
  0x46   : > { %p560_p12 = pnand %p559_p11, %p704_p5  ;;  %p566_p3 = scmp.lt.s32.totalorder %s564_s8, %s558_s3 }
  0x48   : > { %p561_p0 = pneg %p560_p12  ;;  %p567_p9 = por %p566_p3, %p565_p1 }
  0x4a   : > { %p568_p10 = pnand %p567_p9, %p561_p0 }
  0x4c   : > { %571 = shalt.err (!%p568_p10)
}
  0x4d   : > { %473 = dma.hbm_to_vmem [thread:$0]  (%p704_p5), %s770_s23, 128, %s156_s25, %s145_s26  }
  0x4e PF: > { %p458_p13 = scmp.ge.s32.totalorder %s640_s12, 1  ;;  %p160_p2 = scmp.lt.s32.totalorder %s640_s12, 4 }
  0x50   : > { %p161_p4 = pnand %p458_p13, %p160_p2 }
  0x51   : > { %s791_s14 = sand.u32 (!%p161_p4), 1, %s632_s10  }
  0x52   : > { %164 = sbr.rel (%p161_p4) target bundleno = 139 (0x8b), region = 28  ;;  %s459_s16 = sshll.u32 (!%p161_p4), %s791_s14, 5 }
  0x53   : > { %s167_s17 = scalar_lea.sflag (!%p161_p4), [#allocation3], %s791_s14  ;;  %s797_s19 = scalar_lea.vmem (!%p161_p4), [#allocation2], %s459_s16 }
  0x57   : > { %615 = dma.done.wait (%p708_p6), %s167_s17, 512  }
  0x58   : > { %617 = vsyncadd (%p708_p6), %s167_s17, 4294966784  ;;  %s460_s23 = sshll.u32 %s791_s14, 3  ;;  %s176_s24 = scalar_lea.sflag [#allocation6], %s791_s14 }
  0x59   : > { %s179_s25 = scalar_lea.vmem [#allocation5], %s460_s23 }
  0x5a   : > { %619 = dma.done.wait (%p708_p6), %s176_s24, 128  }
  0x5b   : > { %621 = vsyncadd (%p708_p6), %s176_s24, 4294967168  ;;  %v229_v0 = vlaneseq  ;;  %v646_v1 = vmov 1966171168   ;;  %v223_v6 = vld [vmem:[%s179_s25] sm:$0xff]  ;;  %v219_v25 = vld [vmem:[%s797_s19 + $0x10] sm:$0xf] }
  0x5c   : > { %v227_v2 = vunpack.c.l.s4 %v646_v1  ;;  %v225_v9 = vcombine.high %v223_v6, %v223_v6  ;;  %v215_v13 = vld [vmem:[%s797_s19] sm:$0xf]  ;;  %v216_v18 = vld [vmem:[%s797_s19 + $0x4] sm:$0xf]  ;;  %v217_v19 = vld [vmem:[%s797_s19 + $0x8] sm:$0xf] }
  0x5d   : > { %v230_v3 = vshrl.u32 %v229_v0, 7  ;;  %v218_v26 = vld [vmem:[%s797_s19 + $0xc] sm:$0xf]  ;;  %s816_s20 = scalar_lea.vmem [#allocation7], %s459_s16  ;;  %v220_v33 = vld [vmem:[%s797_s19 + $0x14] sm:$0xf] }
  0x5e   : > { %v228_v4 = vunpack.c.0.s8 %v227_v2  ;;  %v221_v34 = vld [vmem:[%s797_s19 + $0x18] sm:$0xf]  ;;  %v222_v40 = vld [vmem:[%s797_s19 + $0x1c] sm:$0xf]  ;;  %s331_s26 = scalar_lea.sflag [#allocation4], %s791_s14  ;;  %p897_p5 = scmp.ne.s32.totalorder %s895_s21, 0 }
  0x5f   : > { %v276_v8 = vsub.s32 0, %v230_v3  ;;  %s463_s27 = sshll.u32 (%p897_p5), %s686_s13, 3 }
  0x60   : > { %v231_v5 = vsub.s32 %v228_v4, %v230_v3  ;;  %s339_s29 = ssub.s32 (%p897_p5), 20, %s463_s27 }
  0x61   : > { %p340_p6 = scmp.lt.s32.totalorder (%p897_p5), %s339_s29, 8 }
  0x62   : > { %v232_v7 = vrot.slane %v223_v6, %v231_v5  ;;  %v239_v12 = vrot.slane %v225_v9, %v231_v5 }
  0x64   : > { %v248_v10 = vrot.slane %v232_v7, %v231_v5  ;;  %v240_v11 = vcombine.high %v232_v7, %v232_v7  ;;  %v255_v17 = vrot.slane %v239_v12, %v231_v5  ;;  %v241_v20 = vcombine.high %v239_v12, %v239_v12 }
  0x66   : > { %v277_v14 = vrot.slane %v248_v10, %v276_v8  ;;  %v262_v15 = vrot.slane %v240_v11, %v231_v5  ;;  %v270_v16 = vcombine.high %v248_v10, %v248_v10  ;;  %v293_v27 = vrot.slane %v255_v17, %v276_v8 }
  0x67   : > { %v269_v28 = vrot.slane %v241_v20, %v231_v5  ;;  %v271_v29 = vcombine.high %v255_v17, %v255_v17 }
  0x68   : > { %v314_v21 = vadd.f32 %v277_v14, %v215_v13  ;;  %v281_v22 = vrot.slane %v262_v15, %v276_v8  ;;  %v285_v23 = vrot.slane %v270_v16, %v276_v8  ;;  %v272_v24 = vcombine.high %v262_v15, %v262_v15 }
  0x69   : > { %v318_v35 = vadd.f32 %v293_v27, %v219_v25  ;;  %v297_v36 = vrot.slane %v269_v28, %v276_v8  ;;  %v301_v37 = vrot.slane %v271_v29, %v276_v8  ;;  %v273_v38 = vcombine.high %v269_v28, %v269_v28 }
  0x6a   : > { %322 = vst [vmem:[%s816_s20] sm:$0xf] %v314_v21  ;;  %v315_v30 = vadd.f32 %v281_v22, %v216_v18  ;;  %v316_v31 = vadd.f32 %v285_v23, %v217_v19  ;;  %v289_v32 = vrot.slane %v272_v24, %v276_v8 }
  0x6b   : > { %326 = vst [vmem:[%s816_s20 + $0x10] sm:$0xf] %v318_v35  ;;  %v319_v41 = vadd.f32 %v297_v36, %v220_v33  ;;  %v320_v42 = vadd.f32 %v301_v37, %v221_v34  ;;  %v305_v43 = vrot.slane %v273_v38, %v276_v8  ;;  %337 = sbr.rel (!%p897_p5) target bundleno = 139 (0x8b), region = 40 }
  0x6c   : > { %323 = vst [vmem:[%s816_s20 + $0x4] sm:$0xf] %v315_v30  ;;  %324 = vst [vmem:[%s816_s20 + $0x8] sm:$0xf] %v316_v31  ;;  %v317_v39 = vadd.f32 %v289_v32, %v218_v26 }
  0x6d   : > { %327 = vst [vmem:[%s816_s20 + $0x14] sm:$0xf] %v319_v41  ;;  %328 = vst [vmem:[%s816_s20 + $0x18] sm:$0xf] %v320_v42  ;;  %v321_v44 = vadd.f32 %v305_v43, %v222_v40 }
  0x6e   : > { %325 = vst [vmem:[%s816_s20 + $0xc] sm:$0xf] %v317_v39 }
  0x6f   : > { %329 = vst [vmem:[%s816_s20 + $0x1c] sm:$0xf] %v321_v44 }
  0x70   : > { %s906_s29 = smov (!%p340_p6, %s339_s29), 8 }
  0x71   : > { %s833_s6 = sshll.u32 %s906_s29, 6 }
  0x72   : > { %s344_s7 = ssub.s32 512, %s833_s6 }
  0x73   : > { %345 = vsyncadd %s331_s26, %s344_s7  ;;  %p465_p7 = scmp.ne.s32.totalorder %s833_s6, 0  ;;  %s472_s21 = sshll.u32 %s686_s13, 9 }
  0x74   : > { %s843_s3 = scalar_lea.hbm %s892_s2, %s472_s21  ;;  %s350_s4 = sshll.u32 %s816_s20, 4  ;;  %s846_s4 = int_to_ptr.vmem [resolvable:$true] %s350_s4 }
  0x75   : > { %s572_s5 = scalar_lea.vmem %s846_s4, %s833_s6  ;;  %s647_s8 = smov [#allocation7]  }
  0x76   : > { %p573_p8 = scmp.ne.s32.totalorder %s846_s4, %s572_s5  ;;  %s576_s16 = sshll.u32 %s647_s8, 4  ;;  %s577_s16 = int_to_ptr.vmem [resolvable:$false] %s576_s16 }
  0x77   : > { %s578_s13 = scalar_lea.vmem %s577_s16, 1024  ;;  %p579_p0 = scmp.lt.s32.totalorder %s846_s4, %s577_s16 }
  0x78   : > { %p574_p11 = pnand %p573_p8, %p465_p7  ;;  %p580_p1 = scmp.lt.s32.totalorder %s578_s13, %s572_s5 }
  0x7a   : > { %p575_p12 = pneg %p574_p11  ;;  %p581_p3 = por %p580_p1, %p579_p0 }
  0x7c   : > { %p582_p9 = pnand %p581_p3, %p575_p12 }
  0x7e   : > { %585 = shalt.err (!%p582_p9)
}
  0x7f   : > { %s586_s17 = scalar_lea.hbm %s843_s3, %s833_s6  ;;  %s590_s24 = scalar_lea.hbm %s892_s2, 1280 }
  0x80   : > { %p587_p10 = scmp.ne.s32.totalorder %s843_s3, %s586_s17  ;;  %p591_p4 = scmp.lt.s32.totalorder %s843_s3, %s892_s2 }
  0x81   : > { %p592_p5 = scmp.lt.s32.totalorder %s590_s24, %s586_s17 }
  0x82   : > { %p588_p13 = pnand %p587_p10, %p465_p7 }
  0x83   : > { %p593_p6 = por %p592_p5, %p591_p4 }
  0x84   : > { %p589_p2 = pneg %p588_p13 }
  0x86   : > { %p594_p8 = pnand %p593_p6, %p589_p2 }
  0x88   : > { %597 = shalt.err (!%p594_p8)
}
  0x89   : > { %s648_s27 = smov 64   ;;  %s649_s29 = smov 4  }
  0x8a   : > { %356 = dma.vmem_to_hbm [thread:$0]  (%p465_p7), %s846_s4, %s833_s6, %s843_s3, %s331_s26, %s648_s27, %s648_s27, %s649_s29  }
  0x8b PF: > { %p481_p11 = scmp.ge.s32.totalorder %s640_s12, 2  ;;  %s365_s7 = sand.u32 1, %s628_s9  }
  0x8c   : > { %p898_p12 = scmp.ne.s32.totalorder %s896_s22, 0  ;;  %s366_s21 = scalar_lea.sflag [#allocation4], %s365_s7 }
  0x8e   : > { %p478_p0 = pnand %p481_p11, %p898_p12 }
  0x90   : > { %p479_p1 = pneg %p478_p0 }
  0x92   : > { %623 = dma.done.wait (%p479_p1), %s366_s21, 512  }
  0x93   : > { %625 = vsyncadd (%p479_p1), %s366_s21, 4294966784  ;;  %p18_p3 = scmp.ge.s32.totalorder %s690_s15, 5   ;;  %s899_s9 = smov %s632_s10 }
  0x94   : > { %s900_s10 = smov %s636_s11  ;;  %s901_s11 = smov %s702_s18 }
  0x95   : > { %s902_s12 = smov %s690_s15  ;;  %20 = sbr.rel (!%p18_p3) target bundleno = 7 (0x7), region = 86 }
  0x9a   :  { %371 = vsyncpa [#allocation3], 1 }
  0x9b   :  { %373 = vsyncpa [#allocation3 + $0x1], 1 }
  0x9c   :  { %374 = vsyncpa [#allocation6], 1 }
  0x9d   :  { %376 = vsyncpa [#allocation6 + $0x1], 1 }
  0x9e   :  { %377 = vsyncpa [#allocation4], 1 }
  0x9f   :  { %379 = vsyncpa [#allocation4 + $0x1], 1 }

</bundles_post_ra>
